<compile_context>
chip_gen: v6e
topology: v6e:2x2x1
jax: 0.10.0
libtpu: 0.0.40
codegen_flags: <defaults>
</compile_context>

<pallas_src>
import functools

import jax
import jax.numpy as jnp
from jax.experimental import pallas as pl
from jax.experimental.pallas import tpu as pltpu

_COLS = 1024      # lane-dense slab width (multiple of 128)
_TM_MAX = 512     # max rows per tile -> <= 2 MiB f32 per block per buffer


def _round_up(a, b):
    return ((a + b - 1) // b) * b


def _mix32(v):
    """32-bit avalanche hash (lowbias32). uint32 in -> uint32 out."""
    v = v ^ (v >> 16)
    v = v * jnp.uint32(0x7FEB352D)
    v = v ^ (v >> 15)
    v = v * jnp.uint32(0x846CA68B)
    v = v ^ (v >> 16)
    return v


def _gaussian_noise_kernel(seed_ref, x_ref, o_ref, *, stdev):
    tm, cols = x_ref.shape
    half = cols // 2

    # Unique 32-bit counter per element *pair*, across the whole array and
    # across grid tiles, folded with the user-provided seed.
    row0 = (pl.program_id(0) * tm).astype(jnp.uint32)
    ri = jax.lax.broadcasted_iota(jnp.uint32, (tm, half), 0)
    ci = jax.lax.broadcasted_iota(jnp.uint32, (tm, half), 1)
    pair = (row0 + ri) * jnp.uint32(half) + ci
    key = seed_ref[0].astype(jnp.uint32) * jnp.uint32(0x9E3779B9)

    b1 = _mix32(pair * jnp.uint32(2) + key)
    b2 = _mix32(pair * jnp.uint32(2) + jnp.uint32(1) + key)

    # 24-bit uniforms in (0, 1): log() is always finite.
    scale = jnp.float32(1.0 / 16777216.0)
    u1 = ((b1 >> 8).astype(jnp.float32) + 0.5) * scale
    u2 = ((b2 >> 8).astype(jnp.float32) + 0.5) * scale

    # Box-Muller, using BOTH outputs (halves transcendental + PRNG work).
    r = jnp.sqrt(-2.0 * jnp.log(u1))
    theta = jnp.float32(2.0 * 3.141592653589793) * u2
    z_cos = r * jnp.cos(theta)
    z_sin = r * jnp.sin(theta)

    x = x_ref[...].astype(jnp.float32)
    sd = jnp.float32(stdev)
    # Two unmasked 512-lane stores (still lane-dense, multiples of 128).
    o_ref[:, :half] = (x[:, :half] + z_cos * sd).astype(o_ref.dtype)
    o_ref[:, half:] = (x[:, half:] + z_sin * sd).astype(o_ref.dtype)


def gaussian_noise(x, stdev, *, seed=0, training=True):
    """Pallas equivalent of GaussianNoise.forward.

    x: NCHW float array. Returns x + N(0, stdev^2) noise if training,
    else x unchanged.
    """
    if not training:
        return x

    orig_shape = x.shape
    total = 1
    for d in orig_shape:
        total *= int(d)

    cols = _COLS
    rows = pl.cdiv(total, cols)
    tm = min(_TM_MAX, _round_up(rows, 8))
    rows_padded = _round_up(rows, tm)
    padded_total = rows_padded * cols

    xflat = x.reshape(-1)
    if padded_total != total:
        xflat = jnp.pad(xflat, (0, padded_total - total))
    x2d = xflat.reshape(rows_padded, cols)

    seed_arr = jnp.asarray([seed], dtype=jnp.int32)
    kernel = functools.partial(_gaussian_noise_kernel, stdev=float(stdev))

    y2d = pl.pallas_call(
        kernel,
        out_shape=jax.ShapeDtypeStruct((rows_padded, cols), x.dtype),
        grid_spec=pltpu.PrefetchScalarGridSpec(
            num_scalar_prefetch=1,                 # seed lands in SMEM
            grid=(rows_padded // tm,),
            in_specs=[pl.BlockSpec((tm, cols), lambda i, seed: (i, 0))],
            out_specs=pl.BlockSpec((tm, cols), lambda i, seed: (i, 0)),
        ),
        compiler_params=pltpu.CompilerParams(
            dimension_semantics=("parallel",),     # independent tiles
        ),
    )(seed_arr, x2d)

    y = y2d.reshape(-1)
    if padded_total != total:
        y = y[:total]
    return y.reshape(orig_shape)


if __name__ == "__main__":
    key = jax.random.PRNGKey(0)
    # Small NCHW input consistent with the module's forward.
    x = jax.random.normal(key, (2, 4, 16, 16), dtype=jnp.float32)
    stdev = 0.1

    # Training mode: noise added in-kernel.
    y = gaussian_noise(x, stdev, seed=42, training=True)
    y = jax.block_until_ready(y)

    # Eval mode: identity.
    y_eval = gaussian_noise(x, stdev, seed=42, training=False)
    y_eval = jax.block_until_ready(y_eval)

    assert y.shape == x.shape and y.dtype == x.dtype
    assert bool(jnp.all(y_eval == x))
    # Noise should be small but nonzero, roughly stdev-scale.
    diff_std = float(jnp.std(y - x))
    assert 0.0 < diff_std < 10.0 * stdev

    print("KERNEL_OK")
</pallas_src>

<mosaic_0001>
module attributes {stable_mosaic.version = 11 : i64} {
  func.func @_gaussian_noise_kernel(%arg0: i32, %arg1: memref<1xi32, #tpu.memory_space<smem>>, %arg2: memref<8x1024xf32, #tpu.memory_space<vmem>>, %arg3: memref<8x1024xf32, #tpu.memory_space<vmem>>) attributes {dimension_semantics = [#tpu.dimension_semantics<parallel>], iteration_bounds = array<i64: 1>, scalar_prefetch = 1 : i64, scratch_operands = 0 : i64, tpu.core_type = #tpu.core_type<tc>, window_params = [{transform_indices = @transform_0, window_bounds = array<i64: 8, 1024>}, {transform_indices = @transform_1, window_bounds = array<i64: 8, 1024>}]} {
    %c8_i32 = arith.constant 8 : i32
    %0 = arith.muli %arg0, %c8_i32 : i32
    %1 = tpu.iota {dimensions = array<i32: 0>} : vector<8x512xi32>
    %2 = tpu.iota {dimensions = array<i32: 1>} : vector<8x512xi32>
    %3 = vector.broadcast %0 : i32 to vector<8x512xi32>
    %4 = arith.addi %3, %1 : vector<8x512xi32>
    %c512_i32 = arith.constant 512 : i32
    %5 = vector.broadcast %c512_i32 : i32 to vector<8x512xi32>
    %6 = arith.muli %4, %5 : vector<8x512xi32>
    %7 = arith.addi %6, %2 : vector<8x512xi32>
    %c0 = arith.constant 0 : index
    %8 = memref.load %arg1[%c0] : memref<1xi32, #tpu.memory_space<smem>>
    %c-1640531527_i32 = arith.constant -1640531527 : i32
    %9 = arith.muli %8, %c-1640531527_i32 : i32
    %c2_i32 = arith.constant 2 : i32
    %10 = vector.broadcast %c2_i32 : i32 to vector<8x512xi32>
    %11 = arith.muli %7, %10 : vector<8x512xi32>
    %12 = vector.broadcast %9 : i32 to vector<8x512xi32>
    %13 = arith.addi %11, %12 : vector<8x512xi32>
    %c16_i32 = arith.constant 16 : i32
    %14 = vector.broadcast %c16_i32 : i32 to vector<8x512xi32>
    %15 = arith.shrui %13, %14 : vector<8x512xi32>
    %16 = arith.xori %13, %15 : vector<8x512xi32>
    %c2146121005_i32 = arith.constant 2146121005 : i32
    %17 = vector.broadcast %c2146121005_i32 : i32 to vector<8x512xi32>
    %18 = arith.muli %16, %17 : vector<8x512xi32>
    %c15_i32 = arith.constant 15 : i32
    %19 = vector.broadcast %c15_i32 : i32 to vector<8x512xi32>
    %20 = arith.shrui %18, %19 : vector<8x512xi32>
    %21 = arith.xori %18, %20 : vector<8x512xi32>
    %c-2073254261_i32 = arith.constant -2073254261 : i32
    %22 = vector.broadcast %c-2073254261_i32 : i32 to vector<8x512xi32>
    %23 = arith.muli %21, %22 : vector<8x512xi32>
    %c16_i32_0 = arith.constant 16 : i32
    %24 = vector.broadcast %c16_i32_0 : i32 to vector<8x512xi32>
    %25 = arith.shrui %23, %24 : vector<8x512xi32>
    %26 = arith.xori %23, %25 : vector<8x512xi32>
    %c2_i32_1 = arith.constant 2 : i32
    %27 = vector.broadcast %c2_i32_1 : i32 to vector<8x512xi32>
    %28 = arith.muli %7, %27 : vector<8x512xi32>
    %c1_i32 = arith.constant 1 : i32
    %29 = vector.broadcast %c1_i32 : i32 to vector<8x512xi32>
    %30 = arith.addi %28, %29 : vector<8x512xi32>
    %31 = vector.broadcast %9 : i32 to vector<8x512xi32>
    %32 = arith.addi %30, %31 : vector<8x512xi32>
    %c16_i32_2 = arith.constant 16 : i32
    %33 = vector.broadcast %c16_i32_2 : i32 to vector<8x512xi32>
    %34 = arith.shrui %32, %33 : vector<8x512xi32>
    %35 = arith.xori %32, %34 : vector<8x512xi32>
    %c2146121005_i32_3 = arith.constant 2146121005 : i32
    %36 = vector.broadcast %c2146121005_i32_3 : i32 to vector<8x512xi32>
    %37 = arith.muli %35, %36 : vector<8x512xi32>
    %c15_i32_4 = arith.constant 15 : i32
    %38 = vector.broadcast %c15_i32_4 : i32 to vector<8x512xi32>
    %39 = arith.shrui %37, %38 : vector<8x512xi32>
    %40 = arith.xori %37, %39 : vector<8x512xi32>
    %c-2073254261_i32_5 = arith.constant -2073254261 : i32
    %41 = vector.broadcast %c-2073254261_i32_5 : i32 to vector<8x512xi32>
    %42 = arith.muli %40, %41 : vector<8x512xi32>
    %c16_i32_6 = arith.constant 16 : i32
    %43 = vector.broadcast %c16_i32_6 : i32 to vector<8x512xi32>
    %44 = arith.shrui %42, %43 : vector<8x512xi32>
    %45 = arith.xori %42, %44 : vector<8x512xi32>
    %c8_i32_7 = arith.constant 8 : i32
    %46 = vector.broadcast %c8_i32_7 : i32 to vector<8x512xi32>
    %47 = arith.shrui %26, %46 : vector<8x512xi32>
    %48 = arith.uitofp %47 : vector<8x512xi32> to vector<8x512xf32>
    %cst = arith.constant 5.000000e-01 : f32
    %49 = vector.broadcast %cst : f32 to vector<8x512xf32>
    %50 = arith.addf %48, %49 : vector<8x512xf32>
    %cst_8 = arith.constant 5.96046448E-8 : f32
    %51 = vector.broadcast %cst_8 : f32 to vector<8x512xf32>
    %52 = arith.mulf %50, %51 : vector<8x512xf32>
    %c8_i32_9 = arith.constant 8 : i32
    %53 = vector.broadcast %c8_i32_9 : i32 to vector<8x512xi32>
    %54 = arith.shrui %45, %53 : vector<8x512xi32>
    %55 = arith.uitofp %54 : vector<8x512xi32> to vector<8x512xf32>
    %cst_10 = arith.constant 5.000000e-01 : f32
    %56 = vector.broadcast %cst_10 : f32 to vector<8x512xf32>
    %57 = arith.addf %55, %56 : vector<8x512xf32>
    %cst_11 = arith.constant 5.96046448E-8 : f32
    %58 = vector.broadcast %cst_11 : f32 to vector<8x512xf32>
    %59 = arith.mulf %57, %58 : vector<8x512xf32>
    %60 = math.log %52 : vector<8x512xf32>
    %cst_12 = arith.constant -2.000000e+00 : f32
    %61 = vector.broadcast %cst_12 : f32 to vector<8x512xf32>
    %62 = arith.mulf %61, %60 : vector<8x512xf32>
    %63 = math.sqrt %62 : vector<8x512xf32>
    %cst_13 = arith.constant 6.28318548 : f32
    %64 = vector.broadcast %cst_13 : f32 to vector<8x512xf32>
    %65 = arith.mulf %64, %59 : vector<8x512xf32>
    %66 = math.cos %65 : vector<8x512xf32>
    %67 = arith.mulf %63, %66 : vector<8x512xf32>
    %68 = math.sin %65 : vector<8x512xf32>
    %69 = arith.mulf %63, %68 : vector<8x512xf32>
    %c0_14 = arith.constant 0 : index
    %c0_15 = arith.constant 0 : index
    %70 = vector.load %arg2[%c0_14, %c0_15] : memref<8x1024xf32, #tpu.memory_space<vmem>>, vector<8x1024xf32>
    %71 = vector.extract_strided_slice %70 {offsets = [0, 0], sizes = [8, 512], strides = [1, 1]} : vector<8x1024xf32> to vector<8x512xf32>
    %cst_16 = arith.constant 1.000000e-01 : f32
    %72 = vector.broadcast %cst_16 : f32 to vector<8x512xf32>
    %73 = arith.mulf %67, %72 : vector<8x512xf32>
    %74 = arith.addf %71, %73 : vector<8x512xf32>
    %c0_17 = arith.constant 0 : index
    %c0_18 = arith.constant 0 : index
    %75 = vector.load %arg3[%c0_17, %c0_18] : memref<8x1024xf32, #tpu.memory_space<vmem>>, vector<8x512xf32>
    tpu.vector_store %arg3[%c0_17, %c0_18], %74 {strides = array<i32>} : memref<8x1024xf32, #tpu.memory_space<vmem>>, vector<8x512xf32>,
    %76 = vector.extract_strided_slice %70 {offsets = [0, 512], sizes = [8, 512], strides = [1, 1]} : vector<8x1024xf32> to vector<8x512xf32>
    %cst_19 = arith.constant 1.000000e-01 : f32
    %77 = vector.broadcast %cst_19 : f32 to vector<8x512xf32>
    %78 = arith.mulf %69, %77 : vector<8x512xf32>
    %79 = arith.addf %76, %78 : vector<8x512xf32>
    %c0_20 = arith.constant 0 : index
    %c512 = arith.constant 512 : index
    %80 = vector.load %arg3[%c0_20, %c512] : memref<8x1024xf32, #tpu.memory_space<vmem>>, vector<8x512xf32>
    tpu.vector_store %arg3[%c0_20, %c512], %79 {strides = array<i32>} : memref<8x1024xf32, #tpu.memory_space<vmem>>, vector<8x512xf32>,
    return
  }
  func.func @transform_0(%arg0: i32, %arg1: memref<1xi32, #tpu.memory_space<smem>>) -> (i32, i32) {
    %c0_i32 = arith.constant 0 : i32
    %c0_i32_0 = arith.constant 0 : i32
    return %arg0, %c0_i32 : i32, i32
  }
  func.func @transform_1(%arg0: i32, %arg1: memref<1xi32, #tpu.memory_space<smem>>) -> (i32, i32) {
    %c0_i32 = arith.constant 0 : i32
    %c0_i32_0 = arith.constant 0 : i32
    return %arg0, %c0_i32 : i32, i32
  }
}

</mosaic_0001>

<bundles_post_ra>
// kernel: tpu_custom_call.1
= control target key start
LH: loop header
LB: loop body
LE: loop exit
PB: predicated region body
PF: predicated region fallthrough
CT: control target
= control target key end

     0   :  { %8 = vsyncpa [#allocation5], 0  ;;  %s1659_s0 = inlined_call_operand.<no memory space> [shape: s32[1], index: 0, kind: input, shape index: {}]   ;;  %s1660_s1 = inlined_call_operand.hbm [shape: f32[8,1024], index: 1, kind: input, shape index: {}]   ;;  %s1661_s2 = inlined_call_operand.hbm [shape: f32[8,1024], index: 2, kind: output, shape index: {}]  }
   0x1   :  { %9 = vsyncpa [#allocation6], 0  ;;  %s1252_s9 = smov [#allocation4]  }
   0x2   :  { %s16_s10 = sshll.u32 %s1252_s9, 4  ;;  %s17_s10 = int_to_ptr.vmem [resolvable:$true] %s16_s10 }
   0x3   :  { %s1216_s11 = scalar_lea.vmem %s17_s10, 1024  ;;  %p1221_p1 = scmp.lt.s32.totalorder %s17_s10, %s17_s10 }
   0x4   :  { %p1217_p0 = scmp.ne.s32.totalorder %s17_s10, %s1216_s11  ;;  %p1222_p2 = scmp.lt.s32.totalorder %s1216_s11, %s1216_s11 }
   0x6   :  { %p1223_p3 = por %p1222_p2, %p1221_p1 }
   0x8   :  { %p1224_p4 = pnand %p1223_p3, %p1217_p0 }
   0xa   :  { %1227 = shalt.err (!%p1224_p4)
}
   0xb   :  { %19 = dma.hbm_to_vmem [thread:$0]  %s1660_s1, 1024, %s17_s10, [#allocation5]  }
   0xc   :  { %1248 = dma.done.wait [#allocation5], 1024  }
   0xd   :  { %1249 = vsyncadd [#allocation5], 4294966272  ;;  %v24_v0 = vlaneseq  ;;  %s39_s16 = smul.u32 2654435769, %s1659_s0  ;;  %s1259_s0 = smov [#allocation7]  }
   0xe   :  { %s1111_s1 = sshll.u32 %s1259_s0, 4  ;;  %s1112_s1 = int_to_ptr.vmem [resolvable:$true] %s1111_s1 }
   0xf   :  { %v25_v1 = vshrl.u32 %v24_v0, 7  ;;  %v27_v2 = vand.u32 127, %v24_v0  ;;  %v44_v15 = vstv %s39_s16  ;;  %s1228_s17 = scalar_lea.vmem %s1112_s1, 1024  ;;  %p1233_p6 = scmp.lt.s32.totalorder %s1112_s1, %s1112_s1 }
  0x10   :  { %p1229_p5 = scmp.ne.s32.totalorder %s1112_s1, %s1228_s17  ;;  %p1234_p7 = scmp.lt.s32.totalorder %s1228_s17, %s1228_s17 }
  0x11   :  { %v28_v3 = vadd.s32 128, %v27_v2  ;;  %v29_v4 = vadd.s32 256, %v27_v2  ;;  %v30_v5 = vadd.s32 384, %v27_v2  ;;  %v33_v6 = vmul.u32 512, %v25_v1 }
  0x12   :  { %p1235_p8 = por %p1234_p7, %p1233_p6 }
  0x13   :  { %v34_v7 = vadd.s32 %v33_v6, %v27_v2  ;;  %v35_v8 = vadd.s32 %v33_v6, %v28_v3  ;;  %v36_v9 = vadd.s32 %v33_v6, %v29_v4  ;;  %v37_v10 = vadd.s32 %v33_v6, %v30_v5 }
  0x14   :  { %p1236_p9 = pnand %p1235_p8, %p1229_p5 }
  0x15   :  { %v40_v11 = vmul.u32 2, %v34_v7  ;;  %v41_v12 = vmul.u32 2, %v35_v8 }
  0x16   :  { %v42_v13 = vmul.u32 2, %v36_v9  ;;  %v43_v14 = vmul.u32 2, %v37_v10 }
  0x17   :  { %v45_v16 = vadd.s32 %v44_v15, %v40_v11  ;;  %v46_v17 = vadd.s32 %v44_v15, %v41_v12  ;;  %v81_v18 = vadd.s32 1, %v40_v11  ;;  %v82_v19 = vadd.s32 1, %v41_v12 }
  0x18   :  { %v47_v20 = vadd.s32 %v44_v15, %v42_v13  ;;  %v48_v21 = vadd.s32 %v44_v15, %v43_v14  ;;  %v83_v22 = vadd.s32 1, %v42_v13  ;;  %v84_v23 = vadd.s32 1, %v43_v14 }
  0x19   :  { %v49_v24 = vshrl.u32 %v45_v16, 16  ;;  %v50_v25 = vshrl.u32 %v46_v17, 16  ;;  %v85_v26 = vadd.s32 %v81_v18, %v44_v15  ;;  %v86_v27 = vadd.s32 %v82_v19, %v44_v15 }
  0x1a   :  { %v51_v28 = vshrl.u32 %v47_v20, 16  ;;  %v52_v29 = vshrl.u32 %v48_v21, 16  ;;  %v87_v30 = vadd.s32 %v83_v22, %v44_v15  ;;  %v88_v31 = vadd.s32 %v84_v23, %v44_v15 }
  0x1b   :  { %v53_v32 = vxor.u32 %v49_v24, %v45_v16  ;;  %v54_v33 = vxor.u32 %v50_v25, %v46_v17  ;;  %v89_v34 = vshrl.u32 %v85_v26, 16  ;;  %v90_v35 = vshrl.u32 %v86_v27, 16 }
  0x1c   :  { %v55_v36 = vxor.u32 %v51_v28, %v47_v20  ;;  %v56_v37 = vxor.u32 %v52_v29, %v48_v21  ;;  %v91_v38 = vshrl.u32 %v87_v30, 16  ;;  %v92_v39 = vshrl.u32 %v88_v31, 16 }
  0x1d   :  { %v57_v40 = vmul.u32 2146121005, %v53_v32  ;;  %v58_v41 = vmul.u32 2146121005, %v54_v33  ;;  %v93_v42 = vxor.u32 %v89_v34, %v85_v26  ;;  %v94_v43 = vxor.u32 %v90_v35, %v86_v27 }
  0x1e   :  { %v59_v44 = vmul.u32 2146121005, %v55_v36  ;;  %v60_v45 = vmul.u32 2146121005, %v56_v37  ;;  %v95_v46 = vxor.u32 %v91_v38, %v87_v30  ;;  %v96_v47 = vxor.u32 %v92_v39, %v88_v31 }
  0x1f   :  { %v61_v48 = vshrl.u32 %v57_v40, 15  ;;  %v62_v49 = vshrl.u32 %v58_v41, 15  ;;  %v97_v50 = vmul.u32 2146121005, %v93_v42  ;;  %v98_v51 = vmul.u32 2146121005, %v94_v43 }
  0x20   :  { %v63_v52 = vshrl.u32 %v59_v44, 15  ;;  %v64_v53 = vshrl.u32 %v60_v45, 15  ;;  %v99_v54 = vmul.u32 2146121005, %v95_v46  ;;  %v100_v60 = vmul.u32 2146121005, %v96_v47 }
  0x21   :  { %v65_v55 = vxor.u32 %v61_v48, %v57_v40  ;;  %v66_v56 = vxor.u32 %v62_v49, %v58_v41  ;;  %v101_v57 = vshrl.u32 %v97_v50, 15  ;;  %v102_v58 = vshrl.u32 %v98_v51, 15 }
  0x22   :  { %v67_v59 = vxor.u32 %v63_v52, %v59_v44  ;;  %v103_v61 = vshrl.u32 %v99_v54, 15  ;;  %v68_v2 = vxor.u32 %v64_v53, %v60_v45  ;;  %v104_v9 = vshrl.u32 %v100_v60, 15 }
  0x23   :  { %v69_v62 = vmul.u32 2221713035, %v65_v55  ;;  %v70_v63 = vmul.u32 2221713035, %v66_v56  ;;  %v105_v0 = vxor.u32 %v101_v57, %v97_v50  ;;  %v106_v1 = vxor.u32 %v102_v58, %v98_v51 }
  0x24   :  { %v71_v3 = vmul.u32 2221713035, %v67_v59  ;;  %v107_v4 = vxor.u32 %v103_v61, %v99_v54  ;;  %v72_v15 = vmul.u32 2221713035, %v68_v2  ;;  %v108_v20 = vxor.u32 %v104_v9, %v100_v60 }
  0x25   :  { %v73_v5 = vshrl.u32 %v69_v62, 16  ;;  %v74_v6 = vshrl.u32 %v70_v63, 16  ;;  %v109_v7 = vmul.u32 2221713035, %v105_v0  ;;  %v110_v8 = vmul.u32 2221713035, %v106_v1 }
  0x26   :  { %v111_v10 = vmul.u32 2221713035, %v107_v4  ;;  %v75_v16 = vshrl.u32 %v71_v3, 16  ;;  %v76_v26 = vshrl.u32 %v72_v15, 16  ;;  %v112_v33 = vmul.u32 2221713035, %v108_v20 }
  0x27   :  { %v77_v11 = vxor.u32 %v73_v5, %v69_v62  ;;  %v78_v12 = vxor.u32 %v74_v6, %v70_v63  ;;  %v113_v13 = vshrl.u32 %v109_v7, 16  ;;  %v114_v14 = vshrl.u32 %v110_v8, 16 }
  0x28   :  { %v115_v17 = vshrl.u32 %v111_v10, 16  ;;  %v79_v27 = vxor.u32 %v75_v16, %v71_v3  ;;  %v80_v37 = vxor.u32 %v76_v26, %v72_v15  ;;  %v116_v47 = vshrl.u32 %v112_v33, 16 }
  0x29   :  { %v121_v18 = vshrl.u32 %v77_v11, 8  ;;  %v122_v19 = vshrl.u32 %v78_v12, 8  ;;  %v117_v21 = vxor.u32 %v113_v13, %v109_v7  ;;  %v118_v22 = vxor.u32 %v114_v14, %v110_v8 }
  0x2a   :  { %v119_v28 = vxor.u32 %v115_v17, %v111_v10  ;;  %v123_v38 = vshrl.u32 %v79_v27, 8  ;;  %v124_v52 = vshrl.u32 %v80_v37, 8  ;;  %v120_v59 = vxor.u32 %v116_v47, %v112_v33 }
  0x2b   :  { %v125_v23 = vshrl.u32 %v121_v18, 16  ;;  %v126_v24 = vand.u32 65535, %v121_v18  ;;  %v131_v25 = vshrl.u32 %v122_v19, 16  ;;  %v132_v30 = vand.u32 65535, %v122_v19 }
  0x2c   :  { %v157_v35 = vshrl.u32 %v117_v21, 8  ;;  %v158_v36 = vshrl.u32 %v118_v22, 8  ;;  %v159_v40 = vshrl.u32 %v119_v28, 8  ;;  %v137_v56 = vshrl.u32 %v123_v38, 16 }
  0x2d   :  { %v127_v29 = vcvt.s32.f32 %v125_v23  ;;  %v129_v31 = vcvt.s32.f32 %v126_v24  ;;  %v133_v32 = vcvt.s32.f32 %v131_v25  ;;  %v135_v39 = vcvt.s32.f32 %v132_v30 }
  0x2e   :  { %v161_v41 = vshrl.u32 %v157_v35, 16  ;;  %v162_v42 = vand.u32 65535, %v157_v35  ;;  %v167_v45 = vshrl.u32 %v158_v36, 16  ;;  %v168_v46 = vand.u32 65535, %v158_v36 }
  0x2f   :  { %v128_v34 = vmul.f32 65536.0, %v127_v29  ;;  %v134_v44 = vmul.f32 65536.0, %v133_v32  ;;  %v173_v54 = vshrl.u32 %v159_v40, 16  ;;  %v174_v61 = vand.u32 65535, %v159_v40 }
  0x30   :  { %v163_v48 = vcvt.s32.f32 %v161_v41  ;;  %v165_v49 = vcvt.s32.f32 %v162_v42  ;;  %v169_v50 = vcvt.s32.f32 %v167_v45  ;;  %v171_v51 = vcvt.s32.f32 %v168_v46 }
  0x31   :  { %v130_v43 = vadd.f32 %v129_v31, %v128_v34  ;;  %v136_v55 = vadd.f32 %v135_v39, %v134_v44  ;;  %v175_v62 = vcvt.s32.f32 %v173_v54  ;;  %v138_v0 = vand.u32 65535, %v123_v38 }
  0x32   :  { %v164_v53 = vmul.f32 65536.0, %v163_v48  ;;  %v170_v58 = vmul.f32 65536.0, %v169_v50  ;;  %v143_v1 = vshrl.u32 %v124_v52, 16  ;;  %v139_v3 = vcvt.s32.f32 %v137_v56 }
  0x33   :  { %v149_v57 = vadd.f32 0.5, %v130_v43  ;;  %v150_v4 = vadd.f32 0.5, %v136_v55  ;;  %v160_v7 = vshrl.u32 %v120_v59, 8  ;;  %v176_v8 = vmul.f32 65536.0, %v175_v62 }
  0x34   :  { %v166_v60 = vadd.f32 %v165_v49, %v164_v53  ;;  %v172_v63 = vadd.f32 %v171_v51, %v170_v58  ;;  %v177_v9 = vcvt.s32.f32 %v174_v61  ;;  %v141_v12 = vcvt.s32.f32 %v138_v0 }
  0x35   :  { %v153_v5 = vmul.f32 5.9604645e-08, %v149_v57  ;;  %v144_v13 = vand.u32 65535, %v124_v52  ;;  %v145_v14 = vcvt.s32.f32 %v143_v1  ;;  %v140_v16 = vmul.f32 65536.0, %v139_v3 }
  0x36   :  { %v185_v2 = vadd.f32 0.5, %v166_v60  ;;  %v186_v6 = vadd.f32 0.5, %v172_v63  ;;  %v154_v17 = vmul.f32 5.9604645e-08, %v150_v4  ;;  %v178_v19 = vadd.f32 %v177_v9, %v176_v8 }
  0x37   :  { %1176 = vlog2.f32 %v153_v5  ;;  %v179_v20 = vshrl.u32 %v160_v7, 16  ;;  %v147_v22 = vcvt.s32.f32 %v144_v13  ;;  %v142_v24 = vadd.f32 %v141_v12, %v140_v16 }
  0x38   :  { %v189_v10 = vmul.f32 5.9604645e-08, %v185_v2  ;;  %v190_v11 = vmul.f32 5.9604645e-08, %v186_v6  ;;  %v146_v25 = vmul.f32 65536.0, %v145_v14  ;;  %1178 = vlog2.f32 %v154_v17 }
  0x39   :  { %v180_v27 = vand.u32 65535, %v160_v7  ;;  %v181_v28 = vcvt.s32.f32 %v179_v20  ;;  %v187_v29 = vadd.f32 0.5, %v178_v19  ;;  %v151_v36 = vadd.f32 0.5, %v142_v24 }
  0x3a   :  { %v1281_v15 = vmul.f32 6.2831855, %v189_v10  ;;  %v1283_v18 = vmul.f32 6.2831855, %v190_v11  ;;  %v148_v34 = vadd.f32 %v147_v22, %v146_v25  ;;  %v1253_v62 = vmov 683565275  }
  0x3b   :  { %v182_v37 = vmul.f32 65536.0, %v181_v28  ;;  %v183_v38 = vcvt.s32.f32 %v180_v27  ;;  %v191_v39 = vmul.f32 5.9604645e-08, %v187_v29  ;;  %v155_v45 = vmul.f32 5.9604645e-08, %v151_v36 }
  0x3c   :  { %v240_v21 = vand.u32 2139095040, %v1281_v15  ;;  %v343_v23 = vand.u32 2139095040, %v1283_v18  ;;  %v237_v31 = vand.u32 2147483647, %v1281_v15  ;;  %v340_v41 = vand.u32 2147483647, %v1283_v18 }
  0x3d   :  { %v152_v43 = vadd.f32 0.5, %v148_v34  ;;  %v184_v46 = vadd.f32 %v183_v38, %v182_v37  ;;  %v1291_v47 = vmul.f32 6.2831855, %v191_v39  ;;  %1180 = vlog2.f32 %v155_v45 }
  0x3e   :  { %v241_v26 = vshrl.u32 %v240_v21, 23  ;;  %v344_v30 = vshrl.u32 %v343_v23, 23  ;;  %v244_v40 = vand.u32 8388607, %v237_v31  ;;  %v1295_v50 = vand.u32 8388607, %v340_v41 }
  0x3f   :  { %v1297_v51 = vmul.f32 5.9604645e-08, %v152_v43  ;;  %v188_v54 = vadd.f32 0.5, %v184_v46  ;;  %v446_v56 = vand.u32 2139095040, %v1291_v47  ;;  %v1254_v0 = vmov 2475754826  }
  0x40   :  { %v1120_v32 = vadd.s32 4294967169, %v241_v26  ;;  %v1124_v33 = vadd.s32 4294967169, %v344_v30  ;;  %v245_v48 = vor.u32 8388608, %v244_v40  ;;  %v348_v59 = vor.u32 8388608, %v1295_v50 }
  0x41   :  { %v1255_v2 = vmov 2131351028   ;;  %v1256_v6 = vmov 2102212464   ;;  %v1257_v8 = vmov 920167782  }
  0x42   :  { %v247_v35 = vadd.s32 1, %v1120_v32  ;;  %v350_v42 = vadd.s32 1, %v1124_v33  ;;  %v1300_v58 = vshll.u32 %v245_v48, 8  ;;  %v1258_v16 = vmov 1326507024  }
  0x43   :  { %v447_v33 = vshrl.u32 %v446_v56, 23  ;;  %v192_v48 = vmul.f32 5.9604645e-08, %v188_v54  ;;  %v1338_v56 = vshll.u32 %v348_v59, 8 }
  0x44   :  { %vm248_vm0 = vcmp.gt.s32.totalorder %v247_v35, 0  ;;  %v1177_v44 = vpop.eup %1176  ;;  %vm351_vm1 = vcmp.gt.s32.totalorder %v350_v42, 0 }
  0x45   :  { %v249_v49 = vsel %vm248_vm0, %v247_v35, 0  ;;  %v194_v52 = vmul.f32 0.6931472, %v1177_v44  ;;  %v1179_v53 = vpop.eup %1178  ;;  %v352_v60 = vsel %vm351_vm1, %v350_v42, 0 }
  0x46   :  { %v251_v55 = vand.u32 31, %v249_v49  ;;  %v250_v57 = vshrl.u32 %v249_v49, 5  ;;  %v196_v4 = vmul.f32 0.6931472, %v1179_v53  ;;  %v354_v13 = vand.u32 31, %v352_v60 }
  0x47   :  { %v1306_v5 = vmul.f32 -2.0, %v194_v52  ;;  %v353_v53 = vshrl.u32 %v352_v60, 5 }
  0x48   :  { %v252_v61 = vsub.s32 32, %v251_v55  ;;  %v254_v63 = vshll.u32 %v1253_v62, %v251_v55  ;;  %v257_v1 = vshll.u32 %v1254_v0, %v251_v55  ;;  %v260_v3 = vshll.u32 %v1255_v2, %v251_v55 }
  0x49   :  { %v263_v7 = vshll.u32 %v1256_v6, %v251_v55  ;;  %v266_v9 = vshll.u32 %v1257_v8, %v251_v55  ;;  %vm269_vm2 = vcmp.lt.s32.totalorder %v250_v57, 1  ;;  %vm272_vm3 = vcmp.lt.s32.totalorder %v250_v57, 4 }
  0x4a   :  { %v255_v10 = vshrl.u32 %v1254_v0, %v252_v61  ;;  %v258_v11 = vshrl.u32 %v1255_v2, %v252_v61  ;;  %v261_v12 = vshrl.u32 %v1256_v6, %v252_v61  ;;  %v264_v14 = vshrl.u32 %v1257_v8, %v252_v61  ;;  %v1181_v46 = vpop.eup %1180 }
  0x4b   :  { %v267_v17 = vshrl.u32 %v1258_v16, %v252_v61  ;;  %v253_v19 = vshrl.u32 %v1253_v62, %v252_v61  ;;  %vm270_vm4 = vcmp.lt.s32.totalorder %v250_v57, 2  ;;  %vm271_vm5 = vcmp.lt.s32.totalorder %v250_v57, 3 }
  0x4c   :  { %v256_v20 = vor.u32 %v255_v10, %v254_v63  ;;  %v259_v21 = vor.u32 %v258_v11, %v257_v1  ;;  %v262_v22 = vor.u32 %v261_v12, %v260_v3  ;;  %v265_v23 = vor.u32 %v264_v14, %v263_v7 }
  0x4d   :  { %v268_v24 = vor.u32 %v267_v17, %v266_v9  ;;  %v355_v28 = vsub.s32 32, %v354_v13  ;;  %v1318_v29 = vmul.f32 -2.0, %v196_v4  ;;  %1182 = vrsqrt.f32 %v1306_v5 }
  0x4e   :  { %v274_v25 = vsel %vm272_vm3, %v262_v22, 2102212464  ;;  %v277_v26 = vsel %vm269_vm2, %v256_v20, %v259_v21  ;;  %v281_v27 = vsel %vm269_vm2, %v259_v21, %v262_v22  ;;  %v278_v30 = vsel %vm272_vm3, %v265_v23, 920167782 }
  0x4f   :  { %v282_v32 = vsel %vm272_vm3, %v268_v24, 1326507024  ;;  %v273_v34 = vsel %vm269_vm2, %v253_v19, %v256_v20  ;;  %v275_v35 = vsel %vm271_vm5, %v259_v21, %v274_v25  ;;  %v279_v36 = vsel %vm271_vm5, %v262_v22, %v278_v30 }
  0x50   :  { %v283_v37 = vsel %vm271_vm5, %v265_v23, %v282_v32  ;;  %v280_v38 = vsel %vm270_vm4, %v277_v26, %v279_v36  ;;  %v357_v40 = vshll.u32 %v1253_v62, %v354_v13  ;;  %v358_v44 = vshrl.u32 %v1254_v0, %v355_v28 }
  0x51   :  { %v284_v39 = vsel %vm270_vm4, %v281_v27, %v283_v37  ;;  %v360_v45 = vshll.u32 %v1254_v0, %v354_v13  ;;  %v276_v49 = vsel %vm270_vm4, %v273_v34, %v275_v35  ;;  %v361_v55 = vshrl.u32 %v1255_v2, %v355_v28 }
  0x52   :  { %v1326_v42 = vmul.u32.u64.low %v1300_v58, %v284_v39  ;;  %v1327_v43 = vmul.u32.u64.high %v1300_v58, %v284_v39, %v1326_v42  ;;  %v1333_v50 = vmul.u32.u64.low %v1300_v58, %v280_v38  ;;  %v1334_v52 = vmul.u32.u64.high %v1300_v58, %v280_v38, %v1333_v50 }
  0x53   :  { %v1128_v61 = vadd.s32 4294967169, %v447_v33  ;;  %1184 = vrsqrt.f32 %v1318_v29  ;;  %v356_v63 = vshrl.u32 %v1253_v62, %v355_v28  ;;  %v363_v1 = vshll.u32 %v1255_v2, %v354_v13 }
  0x54   :  { %v364_v54 = vshrl.u32 %v1256_v6, %v355_v28  ;;  %v292_v57 = vmul.u32 %v1300_v58, %v276_v49  ;;  %vm294_vm6 = vc.u32 %v1327_v43, %v1333_v50  ;;  %v359_v3 = vor.u32 %v358_v44, %v357_v40 }
  0x55   :  { %v362_v60 = vor.u32 %v361_v55, %v360_v45  ;;  %v295_v4 = vadd.s32 1, %v1334_v52  ;;  %v366_v7 = vshll.u32 %v1256_v6, %v354_v13  ;;  %v367_v9 = vshrl.u32 %v1257_v8, %v355_v28 }
  0x56   :  { %v365_v59 = vor.u32 %v364_v54, %v363_v1  ;;  %v369_v10 = vshll.u32 %v1257_v8, %v354_v13  ;;  %v370_v11 = vshrl.u32 %v1258_v16, %v355_v28  ;;  %vm372_vm7 = vcmp.lt.s32.totalorder %v353_v53, 1 }
  0x57   :  { %vm373_vm8 = vcmp.lt.s32.totalorder %v353_v53, 2  ;;  %v296_v58 = vsel %vm294_vm6, %v295_v4, %v1334_v52  ;;  %v368_v12 = vor.u32 %v367_v9, %v366_v7  ;;  %vm374_vm9 = vcmp.lt.s32.totalorder %v353_v53, 3 }
  0x58   :  { %vm375_vm10 = vcmp.lt.s32.totalorder %v353_v53, 4  ;;  %v297_v14 = vadd.s32 %v296_v58, %v292_v57  ;;  %v371_v17 = vor.u32 %v370_v11, %v369_v10  ;;  %v376_v19 = vsel %vm372_vm7, %v356_v63, %v359_v3 }
  0x59   :  { %v377_v20 = vsel %vm375_vm10, %v365_v59, 2102212464  ;;  %v380_v22 = vsel %vm372_vm7, %v359_v3, %v362_v60  ;;  %v381_v23 = vsel %vm375_vm10, %v368_v12, 920167782  ;;  %v384_v24 = vsel %vm372_vm7, %v362_v60, %v365_v59 }
  0x5a   :  { %v378_v21 = vsel %vm374_vm9, %v362_v60, %v377_v20  ;;  %v298_v25 = vadd.s32 536870912, %v297_v14  ;;  %v382_v13 = vsel %vm374_vm9, %v365_v59, %v381_v23  ;;  %v385_v26 = vsel %vm375_vm10, %v371_v17, 1326507024  ;;  %v1183_v34 = vpop.eup %1182 }
  0x5b   :  { %v443_v27 = vand.u32 2147483647, %v1291_v47  ;;  %v379_v28 = vsel %vm373_vm8, %v376_v19, %v378_v21  ;;  %v383_v30 = vsel %vm373_vm8, %v380_v22, %v382_v13  ;;  %v386_v32 = vsel %vm374_vm9, %v368_v12, %v385_v26 }
  0x5c   :  { %v453_v33 = vadd.s32 1, %v1128_v61  ;;  %v1359_v35 = vshrl.u32 %v298_v25, 30  ;;  %v387_v36 = vsel %vm373_vm8, %v384_v24, %v386_v32  ;;  %v198_v39 = vmul.f32 0.6931472, %v1181_v46 }
  0x5d   :  { %v1363_v37 = vmul.u32.u64.low %v1338_v56, %v383_v30  ;;  %v1364_v38 = vmul.u32.u64.high %v1338_v56, %v383_v30, %v1363_v37  ;;  %v1368_v40 = vmul.u32.u64.low %v1338_v56, %v387_v36  ;;  %v1369_v42 = vmul.u32.u64.high %v1338_v56, %v387_v36, %v1368_v40 }
  0x5e   :  { %vm454_vm11 = vcmp.gt.s32.totalorder %v453_v33, 0  ;;  %1186 = vlog2.f32 %v1297_v51  ;;  %v1372_v44 = vmul.f32 6.2831855, %v192_v48  ;;  %v300_v45 = vshll.u32 %v1359_v35, 30 }
  0x5f   :  { %v455_v49 = vsel %vm454_vm11, %v453_v33, 0  ;;  %v206_v52 = vmul.f32 %v1183_v34, %v1306_v5  ;;  %v395_v53 = vmul.u32 %v1338_v56, %v379_v28  ;;  %v1379_v55 = vand.u32 8388607, %v443_v27 }
  0x60   :  { %v457_v46 = vand.u32 31, %v455_v49  ;;  %v1185_v61 = vpop.eup %1184  ;;  %vm207_vm12 = vcmp.eq.f32.partialorder %v1306_v5, inf  ;;  %v1382_v63 = vsub.s32 %v297_v14, %v300_v45  ;;  %v398_v51 = vadd.s32 1, %v1364_v38 }
  0x61   :  { %v546_v48 = vand.u32 2147483647, %v1372_v44  ;;  %v1386_v1 = vmul.f32 -2.0, %v198_v39  ;;  %vm209_vm13 = vcmp.eq.f32.partialorder %v1306_v5, 0.0  ;;  %vm397_vm14 = vc.u32 %v1369_v42, %v1363_v37 }
  0x62   :  { %v458_v56 = vsub.s32 32, %v457_v46  ;;  %v210_v54 = vand.u32 2147483648, %v1306_v5  ;;  %v217_v57 = vand.u32 2147483648, %v1318_v29  ;;  %v303_v3 = vsub.s32 0, %v1382_v63 }
  0x63   :  { %v399_v60 = vsel %vm397_vm14, %v398_v51, %v1364_v38  ;;  %v208_v4 = vsel %vm207_vm12, %v1306_v5, %v206_v52  ;;  %v1397_v59 = vmul.f32 %v1185_v61, %v1318_v29  ;;  %v451_v9 = vor.u32 8388608, %v1379_v55 }
  0x64   :  { %v400_v7 = vadd.s32 %v399_v60, %v395_v53  ;;  %v1121_v10 = vmin.u32 %v303_v3, %v1382_v63  ;;  %v1401_v11 = vshrl.u32 %v455_v49, 5  ;;  %v460_v58 = vshll.u32 %v1253_v62, %v457_v46 }
  0x65   :  { %v461_v12 = vshrl.u32 %v1254_v0, %v458_v56  ;;  %v463_v17 = vshll.u32 %v1254_v0, %v457_v46  ;;  %v464_v19 = vshrl.u32 %v1255_v2, %v458_v56  ;;  %v466_v20 = vshll.u32 %v1255_v2, %v457_v46 }
  0x66   :  { %v401_v14 = vadd.s32 536870912, %v400_v7  ;;  %v305_v21 = vclz %v1121_v10  ;;  %v467_v22 = vshrl.u32 %v1256_v6, %v458_v56  ;;  %v469_v23 = vshll.u32 %v1256_v6, %v457_v46 }
  0x67   :  { %v470_v24 = vshrl.u32 %v1257_v8, %v458_v56  ;;  %v1413_v25 = vsel %vm209_vm13, %v210_v54, %v208_v4  ;;  %v472_v26 = vshll.u32 %v1257_v8, %v457_v46  ;;  %v473_v28 = vshrl.u32 %v1258_v16, %v458_v56 }
  0x68   :  { %v1415_v13 = vshrl.u32 %v401_v14, 30  ;;  %v293_v30 = vadd.s32 %v1333_v50, %v1327_v43  ;;  %v1122_v32 = vadd.s32 4294967294, %v305_v21  ;;  %v459_v33 = vshrl.u32 %v1253_v62, %v458_v56 }
  0x69   :  { %v549_v34 = vand.u32 2139095040, %v1372_v44  ;;  %v462_v38 = vor.u32 %v461_v12, %v460_v58  ;;  %v465_v5 = vor.u32 %v464_v19, %v463_v17  ;;  %v468_v39 = vor.u32 %v467_v22, %v466_v20 }
  0x6a   :  { %v403_v36 = vshll.u32 %v1415_v13, 30  ;;  %vm1123_vm15 = vcmp.lt.s32.totalorder %v1122_v32, 0  ;;  %v471_v40 = vor.u32 %v470_v24, %v469_v23  ;;  %vm475_vm0 = vcmp.lt.s32.totalorder %v1401_v11, 1 }
  0x6b   :  { %vm478_vm1 = vcmp.lt.s32.totalorder %v1401_v11, 4  ;;  %v1426_v45 = vpop.eup %1186  ;;  %v308_v49 = vsel %vm1123_vm15, 0, %v1122_v32  ;;  %v474_v50 = vor.u32 %v473_v28, %v472_v26  ;;  %vm239_vm2 = vcmp.lt.s32.totalorder %v1281_v15, 0 }
  0x6c   :  { %v1428_v43 = vsub.s32 %v400_v7, %v403_v36  ;;  %v480_v52 = vsel %vm478_vm1, %v468_v39, 2102212464  ;;  %v309_v53 = vsub.s32 32, %v308_v49  ;;  %v310_v55 = vshll.u32 %v1382_v63, %v308_v49 }
  0x6d   :  { %v313_v46 = vsub.s32 4294967266, %v308_v49  ;;  %vm477_vm3 = vcmp.lt.s32.totalorder %v1401_v11, 3  ;;  %vm476_vm4 = vcmp.lt.s32.totalorder %v1401_v11, 2  ;;  %v479_v51 = vsel %vm475_vm0, %v459_v33, %v462_v38 }
  0x6e   :  { %v406_v61 = vsub.s32 0, %v1428_v43  ;;  %v481_v56 = vsel %vm477_vm3, %v465_v5, %v480_v52  ;;  %v311_v54 = vshrl.u32 %v293_v30, %v309_v53  ;;  %v483_v60 = vsel %vm475_vm0, %v462_v38, %v465_v5 }
  0x6f   :  { %v314_v3 = vadd.s32 127, %v313_v46  ;;  %v484_v63 = vsel %vm478_vm1, %v471_v40, 920167782  ;;  %v323_v4 = vsub.s32 4, %v1359_v35  ;;  %vm342_vm5 = vcmp.lt.s32.totalorder %v1283_v18, 0 }
  0x70   :  { %v1125_v7 = vmin.u32 %v406_v61, %v1428_v43  ;;  %v426_v10 = vsub.s32 4, %v1415_v13  ;;  %v491_v58 = vshll.u32 %v451_v9, 8  ;;  %vm1451_vm6 = vcmp.le.f32.partialorder %v237_v31, 0.7853982 }
  0x71   :  { %v312_v14 = vor.u32 %v311_v54, %v310_v55  ;;  %v315_v17 = vshll.u32 %v314_v3, 23  ;;  %v485_v19 = vsel %vm477_vm3, %v468_v39, %v484_v63  ;;  %v487_v20 = vsel %vm475_vm0, %v465_v5, %v468_v39 }
  0x72   :  { %v408_v21 = vclz %v1125_v7  ;;  %v482_v22 = vsel %vm476_vm4, %v479_v51, %v481_v56  ;;  %v486_v9 = vsel %vm476_vm4, %v483_v60, %v485_v19  ;;  %v488_v31 = vsel %vm478_vm1, %v474_v50, 1326507024 }
  0x73   :  { %v316_v23 = vor.u32 4788187, %v315_v17  ;;  %v319_v24 = vcvt.s32.f32 %v312_v14  ;;  %v489_v26 = vsel %vm477_vm3, %v471_v40, %v488_v31  ;;  %v550_v28 = vshrl.u32 %v549_v34, 23 }
  0x74   :  { %vm1469_vm7 = vcmp.le.f32.partialorder %v340_v41, 0.7853982  ;;  %v1126_v32 = vadd.s32 4294967294, %v408_v21  ;;  %v490_v33 = vsel %vm476_vm4, %v487_v20, %v489_v26  ;;  %v324_v41 = vsel %vm239_vm2, %v323_v4, %v1359_v35 }
  0x75   :  { %v1475_v36 = vmul.u32.u64.low %v491_v58, %v486_v9  ;;  %v1476_v38 = vmul.u32.u64.high %v491_v58, %v486_v9, %v1475_v36  ;;  %v317_v5 = vand.u32 2147483647, %v316_v23  ;;  %v1132_v40 = vadd.s32 4294967169, %v550_v28 }
  0x76   :  { %v1479_v39 = vmul.u32.u64.low %v491_v58, %v490_v33  ;;  %v1480_v49 = vmul.u32.u64.high %v491_v58, %v490_v33, %v1479_v39  ;;  %v396_v34 = vadd.s32 %v1363_v37, %v1369_v42  ;;  %vm1127_vm8 = vcmp.lt.s32.totalorder %v1126_v32, 0 }
  0x77   :  { %v1489_v11 = vand.u32 8388607, %v546_v48  ;;  %v320_v50 = vmul.f32 %v319_v24, %v317_v5  ;;  %v411_v52 = vsel %vm1127_vm8, 0, %v1126_v32  ;;  %v498_v53 = vmul.u32 %v491_v58, %v482_v22 }
  0x78   :  { %v556_v55 = vadd.s32 1, %v1132_v40  ;;  %v412_v46 = vsub.s32 32, %v411_v52  ;;  %v413_v61 = vshll.u32 %v1428_v43, %v411_v52  ;;  %v416_v51 = vsub.s32 4294967266, %v411_v52 }
  0x79   :  { %v501_v56 = vadd.s32 1, %v1476_v38  ;;  %v321_v54 = vxor.u32 2147483648, %v320_v50  ;;  %v427_v35 = vsel %vm342_vm5, %v426_v10, %v1415_v13  ;;  %vm500_vm9 = vc.u32 %v1480_v49, %v1475_v36 }
  0x7a   :  { %vm557_vm10 = vcmp.gt.s32.totalorder %v556_v55, 0  ;;  %v414_v37 = vshrl.u32 %v396_v34, %v412_v46  ;;  %v417_v42 = vadd.s32 127, %v416_v51  ;;  %v326_v63 = vsel %vm1451_vm6, 0, %v324_v41 }
  0x7b   :  { %v502_v3 = vsel %vm500_vm9, %v501_v56, %v1476_v38  ;;  %v558_v60 = vsel %vm557_vm10, %v556_v55, 0  ;;  %v322_v43 = vsel %vm239_vm2, %v321_v54, %v320_v50  ;;  %v1506_v10 = vand.u32 3, %v326_v63 }
  0x7c   :  { %v503_v4 = vadd.s32 %v502_v3, %v498_v53  ;;  %v560_v7 = vand.u32 31, %v558_v60  ;;  %v325_v13 = vsel %vm1451_vm6, %v1281_v15, %v322_v43  ;;  %v415_v58 = vor.u32 %v414_v37, %v413_v61 }
  0x7d   :  { %v418_v14 = vshll.u32 %v417_v42, 23  ;;  %1188 = vcosq.f32 %v325_v13  ;;  %v429_v17 = vsel %vm1469_vm7, 0, %v427_v35  ;;  %v559_v32 = vshrl.u32 %v558_v60, 5 }
  0x7e   :  { %v504_v19 = vadd.s32 536870912, %v503_v4  ;;  %v561_v20 = vsub.s32 32, %v560_v7  ;;  %1190 = vsinq.f32 %v325_v13  ;;  %v422_v22 = vcvt.s32.f32 %v415_v58 }
  0x7f   :  { %v419_v21 = vor.u32 4788187, %v418_v14  ;;  %v563_v9 = vshll.u32 %v1253_v62, %v560_v7  ;;  %v566_v23 = vshll.u32 %v1254_v0, %v560_v7  ;;  %v1516_v28 = vand.u32 3, %v429_v17 }
  0x80   :  { %v1511_v31 = vshrl.u32 %v504_v19, 30  ;;  %v564_v12 = vshrl.u32 %v1254_v0, %v561_v20  ;;  %v567_v24 = vshrl.u32 %v1255_v2, %v561_v20  ;;  %v572_v33 = vshll.u32 %v1256_v6, %v560_v7 }
  0x81   :  { %v420_v26 = vand.u32 2147483647, %v419_v21  ;;  %v554_v5 = vor.u32 8388608, %v1489_v11  ;;  %v569_v39 = vshll.u32 %v1255_v2, %v560_v7  ;;  %v570_v40 = vshrl.u32 %v1256_v6, %v561_v20 }
  0x82   :  { %v506_v38 = vshll.u32 %v1511_v31, 30  ;;  %vm335_vm11 = vcmp.eq.s32.totalorder %v1506_v10, 2  ;;  %v573_v0 = vshrl.u32 %v1257_v8, %v561_v20  ;;  %v575_v34 = vshll.u32 %v1257_v8, %v560_v7 }
  0x83   :  { %v423_v41 = vmul.f32 %v422_v22, %v420_v26  ;;  %v746_v50 = vadd.s32 3, %v326_v63  ;;  %vm332_vm12 = vcmp.eq.s32.totalorder %v1506_v10, 0  ;;  %v565_v53 = vor.u32 %v564_v12, %v563_v9 }
  0x84   :  { %v1527_v52 = vsub.s32 %v503_v4, %v506_v38  ;;  %v568_v55 = vor.u32 %v567_v24, %v566_v23  ;;  %v576_v11 = vshrl.u32 %v1258_v16, %v561_v20  ;;  %vm331_vm13 = vcmp.lt.s32.totalorder %v1506_v10, 2 }
  0x85   :  { %v424_v2 = vxor.u32 2147483648, %v423_v41  ;;  %v562_v6 = vshrl.u32 %v1253_v62, %v561_v20  ;;  %v574_v46 = vor.u32 %v573_v0, %v572_v33  ;;  %vm578_vm14 = vcmp.lt.s32.totalorder %v559_v32, 1 }
  0x86   :  { %vm329_vm15 = vweird.f32 %v1281_v15  ;;  %v509_v8 = vsub.s32 0, %v1527_v52  ;;  %v571_v61 = vor.u32 %v570_v40, %v569_v39  ;;  %v1534_v51 = vshll.u32 %v554_v5, 8 }
  0x87   :  { %v850_v56 = vadd.s32 3, %v429_v17  ;;  %v425_v54 = vsel %vm342_vm5, %v424_v2, %v423_v41  ;;  %v577_v35 = vor.u32 %v576_v11, %v575_v34  ;;  %vm580_vm0 = vcmp.lt.s32.totalorder %v559_v32, 3 }
  0x88   :  { %vm581_vm1 = vcmp.lt.s32.totalorder %v559_v32, 4  ;;  %v428_v62 = vsel %vm1469_vm7, %v1283_v18, %v425_v54  ;;  %v1129_v16 = vmin.u32 %v509_v8, %v1527_v52  ;;  %vm579_vm2 = vcmp.lt.s32.totalorder %v559_v32, 2 }
  0x89   :  { %v586_v37 = vsel %vm578_vm14, %v565_v53, %v568_v55  ;;  %1192 = vcosq.f32 %v428_v62  ;;  %v582_v42 = vsel %vm578_vm14, %v562_v6, %v565_v53  ;;  %v583_v3 = vsel %vm581_vm1, %v571_v61, 2102212464 }
  0x8a   :  { %v587_v60 = vsel %vm581_vm1, %v574_v46, 920167782  ;;  %vm214_vm3 = vcmp.eq.f32.partialorder %v1318_v29, inf  ;;  %1194 = vsinq.f32 %v428_v62  ;;  %v511_v43 = vclz %v1129_v16  ;;  %v1189_v4 = vpop.eup %1188  ;;  %v1073_v16 = vld [vmem:[#allocation4] sm:$0xff] }
  0x8b   :  { %v584_v63 = vsel %vm580_vm0, %v568_v55, %v583_v3  ;;  %v588_v30 = vsel %vm580_vm0, %v571_v61, %v587_v60  ;;  %v499_v7 = vadd.s32 %v1475_v36, %v1480_v49  ;;  %v590_v58 = vsel %vm578_vm14, %v568_v55, %v571_v61  ;;  %v1191_v17 = vpop.eup %1190 }
  0x8c   :  { %v589_v13 = vsel %vm579_vm2, %v586_v37, %v588_v30  ;;  %v591_v14 = vsel %vm581_vm1, %v577_v35, 1326507024  ;;  %v336_v19 = vxor.u32 2147483648, %v1189_v4  ;;  %v1130_v20 = vadd.s32 4294967294, %v511_v43 }
  0x8d   :  { %v585_v21 = vsel %vm579_vm2, %v582_v42, %v584_v63  ;;  %v592_v22 = vsel %vm580_vm0, %v574_v46, %v591_v14  ;;  %v333_v9 = vxor.u32 2147483648, %v1191_v17  ;;  %vm216_vm4 = vcmp.eq.f32.partialorder %v1318_v29, 0.0 }
  0x8e   :  { %v593_v12 = vsel %vm579_vm2, %v590_v58, %v592_v22  ;;  %v1558_v23 = vmul.u32.u64.low %v1534_v51, %v589_v13  ;;  %v1559_v24 = vmul.u32.u64.high %v1534_v51, %v589_v13, %v1558_v23  ;;  %v337_v36 = vsel %vm335_vm11, %v336_v19, %v1191_v17 }
  0x8f   :  { %vm1131_vm5 = vcmp.lt.s32.totalorder %v1130_v20, 0  ;;  %v1566_v49 = vmul.u32.u64.low %v1534_v51, %v593_v12  ;;  %v1567_v26 = vmul.u32.u64.high %v1534_v51, %v593_v12, %v1566_v49  ;;  %v334_v33 = vsel %vm332_vm12, %v1189_v4, %v333_v9 }
  0x90   :  { %v514_v32 = vsel %vm1131_vm5, 0, %v1130_v20  ;;  %v601_v38 = vmul.u32 %v1534_v51, %v585_v21  ;;  %v747_v5 = vand.u32 3, %v746_v50  ;;  %v338_v39 = vsel %vm331_vm13, %v334_v33, %v337_v36 }
  0x91   :  { %v515_v40 = vsub.s32 32, %v514_v32  ;;  %v516_v41 = vshll.u32 %v1527_v52, %v514_v32  ;;  %v519_v0 = vsub.s32 4294967266, %v514_v32  ;;  %v339_v34 = vsel %vm329_vm15, nan, %v338_v39  ;;  %v1074_v32 = vld [vmem:[#allocation4 + $0x8] sm:$0xff] }
  0x92   :  { %vm432_vm6 = vweird.f32 %v1283_v18  ;;  %v604_v53 = vadd.s32 1, %v1559_v24  ;;  %vm749_vm7 = vcmp.eq.s32.totalorder %v747_v5, 0  ;;  %v851_v55 = vand.u32 3, %v850_v56 }
  0x93   :  { %v517_v11 = vshrl.u32 %v499_v7, %v515_v40  ;;  %v520_v2 = vadd.s32 127, %v519_v0  ;;  %vm603_vm8 = vc.u32 %v1567_v26, %v1558_v23  ;;  %vm748_vm9 = vcmp.lt.s32.totalorder %v747_v5, 2  ;;  %v1078_v0 = vld [vmem:[#allocation4 + $0x28] sm:$0xff] }
  0x94   :  { %vm445_vm10 = vcmp.lt.s32.totalorder %v1291_v47, 0  ;;  %v605_v10 = vsel %vm603_vm8, %v604_v53, %v1559_v24  ;;  %v649_v50 = vmul.f32 %v339_v34, %v1413_v25  ;;  %v751_v52 = vsel %vm749_vm7, %v1189_v4, %v333_v9 }
  0x95   :  { %vm752_vm11 = vcmp.eq.s32.totalorder %v747_v5, 2  ;;  %v518_v6 = vor.u32 %v517_v11, %v516_v41  ;;  %v521_v46 = vshll.u32 %v520_v2, 23  ;;  %v606_v8 = vadd.s32 %v605_v10, %v601_v38  ;;  %v1077_v41 = vld [vmem:[#allocation4 + $0x20] sm:$0xff] }
  0x96   :  { %v754_v61 = vsel %vm752_vm11, %v336_v19, %v1191_v17  ;;  %v215_v51 = vsel %vm214_vm3, %v1318_v29, %v1397_v59  ;;  %1196 = vrsqrt.f32 %v1386_v1  ;;  %vm434_vm12 = vcmp.lt.s32.totalorder %v1516_v28, 2  ;;  %v1193_v56 = vpop.eup %1192 }
  0x97   :  { %vm435_vm13 = vcmp.eq.s32.totalorder %v1516_v28, 0  ;;  %vm438_vm14 = vcmp.eq.s32.totalorder %v1516_v28, 2  ;;  %v522_v54 = vor.u32 4788187, %v521_v46  ;;  %v525_v35 = vcvt.s32.f32 %v518_v6  ;;  %v1195_v37 = vpop.eup %1194 }
  0x98   :  { %v607_v62 = vadd.s32 536870912, %v606_v8  ;;  %v439_v42 = vxor.u32 2147483648, %v1193_v56  ;;  %v755_v3 = vsel %vm748_vm9, %v751_v52, %v754_v61  ;;  %vm856_vm0 = vcmp.eq.s32.totalorder %v851_v55, 2 }
  0x99   :  { %v1081_v60 = vmul.f32 0.1, %v649_v50  ;;  %v436_v59 = vxor.u32 2147483648, %v1195_v37  ;;  %v523_v43 = vand.u32 2147483647, %v522_v54  ;;  %vm853_vm1 = vcmp.eq.s32.totalorder %v851_v55, 0 }
  0x9a   :  { %v1593_v63 = vshrl.u32 %v607_v62, 30  ;;  %v218_v30 = vsel %vm216_vm4, %v217_v57, %v215_v51  ;;  %v440_v4 = vsel %vm438_vm14, %v439_v42, %v1195_v37  ;;  %vm852_vm2 = vcmp.lt.s32.totalorder %v851_v55, 2 }
  0x9b   :  { %v1085_v7 = vadd.f32 %v1081_v60, %v1073_v16  ;;  %v437_v13 = vsel %vm435_vm13, %v1193_v56, %v436_v59  ;;  %v526_v58 = vmul.f32 %v525_v35, %v523_v43  ;;  %v858_v17 = vsel %vm856_vm0, %v439_v42, %v1195_v37 }
  0x9c   :  { %v609_v14 = vshll.u32 %v1593_v63, 30  ;;  %v441_v19 = vsel %vm434_vm12, %v437_v13, %v440_v4  ;;  %v529_v20 = vsub.s32 4, %v1511_v31  ;;  %v756_v21 = vsel %vm329_vm15, nan, %v755_v3 }
  0x9d   :  { %v855_v29 = vsel %vm853_vm1, %v1193_v56, %v436_v59  ;;  %1089 = vst [vmem:[#allocation7] sm:$0xff] %v1085_v7  ;;  %v442_v57 = vsel %vm432_vm6, nan, %v441_v19  ;;  %vm1611_vm3 = vcmp.le.f32.partialorder %v443_v27, 0.7853982  ;;  %v527_v9 = vxor.u32 2147483648, %v526_v58 }
  0x9e   :  { %v610_v12 = vsub.s32 %v606_v8, %v609_v14  ;;  %v650_v28 = vmul.f32 %v442_v57, %v218_v30  ;;  %v859_v24 = vsel %vm852_vm2, %v855_v29, %v858_v17  ;;  %v1069_v33 = vmul.f32 %v756_v21, %v1413_v25 }
  0x9f   :  { %v528_v15 = vsel %vm445_vm10, %v527_v9, %v526_v58  ;;  %v860_v49 = vsel %vm432_vm6, nan, %v859_v24  ;;  %v530_v27 = vsel %vm445_vm10, %v529_v20, %v1511_v31  ;;  %v602_v52 = vadd.s32 %v1558_v23, %v1567_v26  ;;  %v1079_v24 = vld [vmem:[#allocation4 + $0x30] sm:$0xff] }
  0xa0   :  { %v612_v36 = vsub.s32 0, %v610_v12  ;;  %v531_v38 = vsel %vm1611_vm3, %v1291_v47, %v528_v15  ;;  %v1070_v5 = vmul.f32 %v860_v49, %v218_v30  ;;  %v1082_v39 = vmul.f32 0.1, %v650_v28  ;;  %v1075_v28 = vld [vmem:[#allocation4 + $0x10] sm:$0xff] }
  0xa1   :  { %1198 = vcosq.f32 %v531_v38  ;;  %v532_v25 = vsel %vm1611_vm3, 0, %v530_v27  ;;  %v1093_v55 = vmul.f32 0.1, %v1069_v33  ;;  %v200_v6 = vmul.f32 0.6931472, %v1426_v45 }
  0xa2   :  { %v1133_v40 = vmin.u32 %v612_v36, %v610_v12  ;;  %1200 = vsinq.f32 %v531_v38  ;;  %v1086_v18 = vadd.f32 %v1082_v39, %v1074_v32  ;;  %v1094_v11 = vmul.f32 0.1, %v1070_v5 }
  0xa3   :  { %v1197_v34 = vpop.eup %1196  ;;  %v1097_v2 = vadd.f32 %v1093_v55, %v1077_v41  ;;  %v954_v50 = vadd.s32 3, %v532_v25  ;;  %v536_v54 = vand.u32 3, %v532_v25  ;;  %vm221_vm4 = vcmp.eq.f32.partialorder %v1386_v1, inf }
  0xa4   :  { %v614_v53 = vclz %v1133_v40  ;;  %1090 = vst [vmem:[#allocation7 + $0x8] sm:$0xff] %v1086_v18  ;;  %v1098_v10 = vadd.f32 %v1094_v11, %v1078_v0  ;;  %v220_v56 = vmul.f32 %v1197_v34, %v1386_v1  ;;  %v1634_v37 = vmul.f32 -2.0, %v200_v6 }
  0xa5   :  { %1101 = vst [vmem:[#allocation7 + $0x20] sm:$0xff] %v1097_v2  ;;  %v955_v35 = vand.u32 3, %v954_v50  ;;  %vm223_vm5 = vcmp.eq.f32.partialorder %v1386_v1, 0.0  ;;  %v224_v23 = vand.u32 2147483648, %v1386_v1  ;;  %vm538_vm6 = vcmp.eq.s32.totalorder %v536_v54, 0 }
  0xa6   :  { %v1134_v31 = vadd.s32 4294967294, %v614_v53  ;;  %1102 = vst [vmem:[#allocation7 + $0x28] sm:$0xff] %v1098_v10  ;;  %v222_v3 = vsel %vm221_vm4, %v1386_v1, %v220_v56  ;;  %vm541_vm7 = vcmp.eq.s32.totalorder %v536_v54, 2  ;;  %vm537_vm10 = vcmp.lt.s32.totalorder %v536_v54, 2  ;;  %v1076_v56 = vld [vmem:[#allocation4 + $0x18] sm:$0xff] }
  0xa7   :  { %vm960_vm8 = vcmp.eq.s32.totalorder %v955_v35, 2  ;;  %vm957_vm9 = vcmp.eq.s32.totalorder %v955_v35, 0  ;;  %vm956_vm11 = vcmp.lt.s32.totalorder %v955_v35, 2  ;;  %vm535_vm12 = vweird.f32 %v1291_v47  ;;  %v1080_v54 = vld [vmem:[#allocation4 + $0x38] sm:$0xff] }
  0xa8   :  { %vm1135_vm15 = vcmp.lt.s32.totalorder %v1134_v31, 0  ;;  %v225_v14 = vsel %vm223_vm5, %v224_v23, %v222_v3  ;;  %1202 = vrsqrt.f32 %v1634_v37  ;;  %vm548_vm13 = vcmp.lt.s32.totalorder %v1372_v44, 0 }
  0xa9   :  { %v617_v46 = vsel %vm1135_vm15, 0, %v1134_v31  ;;  %v632_v22 = vsub.s32 4, %v1593_v63  ;;  %vm547_vm14 = vcmp.le.f32.partialorder %v546_v48, 0.7853982  ;;  %vm228_vm0 = vcmp.eq.f32.partialorder %v1634_v37, inf }
  0xaa   :  { %v618_v8 = vsub.s32 32, %v617_v46  ;;  %v619_v61 = vshll.u32 %v610_v12, %v617_v46  ;;  %v622_v51 = vsub.s32 4294967266, %v617_v46  ;;  %vm230_vm1 = vcmp.eq.f32.partialorder %v1634_v37, 0.0 }
  0xab   :  { %v633_v33 = vsel %vm548_vm13, %v632_v22, %v1593_v63  ;;  %v231_v63 = vand.u32 2147483648, %v1634_v37 }
  0xac   :  { %v620_v62 = vshrl.u32 %v602_v52, %v618_v8  ;;  %v623_v16 = vadd.s32 127, %v622_v51  ;;  %v635_v5 = vsel %vm547_vm14, 0, %v633_v33 }
  0xad   :  { %v1058_v48 = vadd.s32 3, %v635_v5  ;;  %v639_v40 = vand.u32 3, %v635_v5 }
  0xae   :  { %v621_v26 = vor.u32 %v620_v62, %v619_v61  ;;  %v624_v45 = vshll.u32 %v623_v16, 23  ;;  %v1199_v42 = vpop.eup %1198 }
  0xaf   :  { %v1201_v60 = vpop.eup %1200  ;;  %v542_v59 = vxor.u32 2147483648, %v1199_v42  ;;  %v1059_v41 = vand.u32 3, %v1058_v48  ;;  %vm644_vm2 = vcmp.eq.s32.totalorder %v639_v40, 2  ;;  %vm641_vm15 = vcmp.eq.s32.totalorder %v639_v40, 0 }
  0xb0   :  { %v625_v43 = vor.u32 4788187, %v624_v45  ;;  %v628_v30 = vcvt.s32.f32 %v621_v26  ;;  %v539_v4 = vxor.u32 2147483648, %v1201_v60  ;;  %vm640_vm5 = vcmp.lt.s32.totalorder %v639_v40, 2 }
  0xb1   :  { %v543_v7 = vsel %vm541_vm7, %v542_v59, %v1201_v60  ;;  %v962_v58 = vsel %vm960_vm8, %v542_v59, %v1201_v60  ;;  %vm1064_vm3 = vcmp.eq.s32.totalorder %v1059_v41, 2  ;;  %vm1061_vm4 = vcmp.eq.s32.totalorder %v1059_v41, 0 }
  0xb2   :  { %v626_v13 = vand.u32 2147483647, %v625_v43  ;;  %v540_v17 = vsel %vm538_vm6, %v1199_v42, %v539_v4  ;;  %v959_v19 = vsel %vm957_vm9, %v1199_v42, %v539_v4  ;;  %vm1060_vm6 = vcmp.lt.s32.totalorder %v1059_v41, 2 }
  0xb3   :  { %v544_v20 = vsel %vm537_vm10, %v540_v17, %v543_v7  ;;  %v963_v29 = vsel %vm956_vm11, %v959_v19, %v962_v58  ;;  %vm638_vm7 = vweird.f32 %v1372_v44 }
  0xb4   :  { %v629_v21 = vmul.f32 %v628_v30, %v626_v13  ;;  %v545_v57 = vsel %vm535_vm12, nan, %v544_v20  ;;  %v964_v47 = vsel %vm535_vm12, nan, %v963_v29 }
  0xb5   :  { %v651_v1 = vmul.f32 %v545_v57, %v225_v14  ;;  %v1071_v12 = vmul.f32 %v964_v47, %v225_v14  ;;  %v1203_v39 = vpop.eup %1202 }
  0xb6   :  { %v630_v9 = vxor.u32 2147483648, %v629_v21  ;;  %v227_v0 = vmul.f32 %v1203_v39, %v1634_v37 }
  0xb7   :  { %v1083_v36 = vmul.f32 0.1, %v651_v1  ;;  %v1095_v49 = vmul.f32 0.1, %v1071_v12 }
  0xb8   :  { %v631_v15 = vsel %vm548_vm13, %v630_v9, %v629_v21  ;;  %v229_v25 = vsel %vm228_vm0, %v1634_v37, %v227_v0 }
  0xb9   :  { %v634_v32 = vsel %vm547_vm14, %v1372_v44, %v631_v15  ;;  %v1087_v27 = vadd.f32 %v1083_v36, %v1075_v28  ;;  %v1099_v38 = vadd.f32 %v1095_v49, %v1079_v24  ;;  %v232_v2 = vsel %vm230_vm1, %v231_v63, %v229_v25 }
  0xba   :  { %1204 = vcosq.f32 %v634_v32 }
  0xbb   :  { %1206 = vsinq.f32 %v634_v32  ;;  %1091 = vst [vmem:[#allocation7 + $0x10] sm:$0xff] %v1087_v27  ;;  %1103 = vst [vmem:[#allocation7 + $0x30] sm:$0xff] %v1099_v38 }
  0xc7   :  { %v1205_v18 = vpop.eup %1204 }
  0xc8   :  { %v1207_v34 = vpop.eup %1206  ;;  %v645_v53 = vxor.u32 2147483648, %v1205_v18 }
  0xc9   :  { %v642_v55 = vxor.u32 2147483648, %v1207_v34 }
  0xca   :  { %v646_v11 = vsel %vm644_vm2, %v645_v53, %v1207_v34  ;;  %v1066_v31 = vsel %vm1064_vm3, %v645_v53, %v1207_v34 }
  0xcb   :  { %v643_v10 = vsel %vm641_vm15, %v1205_v18, %v642_v55  ;;  %v1063_v50 = vsel %vm1061_vm4, %v1205_v18, %v642_v55 }
  0xcc   :  { %v647_v52 = vsel %vm640_vm5, %v643_v10, %v646_v11  ;;  %v1067_v6 = vsel %vm1060_vm6, %v1063_v50, %v1066_v31 }
  0xcd   :  { %v648_v46 = vsel %vm638_vm7, nan, %v647_v52  ;;  %v1068_v8 = vsel %vm638_vm7, nan, %v1067_v6 }
  0xce   :  { %v652_v61 = vmul.f32 %v648_v46, %v232_v2  ;;  %v1072_v51 = vmul.f32 %v1068_v8, %v232_v2 }
  0xd0   :  { %v1084_v35 = vmul.f32 0.1, %v652_v61  ;;  %v1096_v62 = vmul.f32 0.1, %v1072_v51 }
  0xd2   :  { %v1088_v16 = vadd.f32 %v1084_v35, %v1076_v56  ;;  %v1100_v37 = vadd.f32 %v1096_v62, %v1080_v54 }
  0xd4   :  { %1092 = vst [vmem:[#allocation7 + $0x18] sm:$0xff] %v1088_v16  ;;  %1104 = vst [vmem:[#allocation7 + $0x38] sm:$0xff] %v1100_v37 }
  0xd5   :  { %1239 = shalt.err (!%p1236_p9)
}
  0xd6   :  { %1114 = dma.vmem_to_hbm [thread:$0]  %s1112_s1, 1024, %s1661_s2, [#allocation6]  }
  0xd7   :  { %1250 = dma.done.wait [#allocation6], 1024  }
  0xd8   :  { %1251 = vsyncadd [#allocation6], 4294966272 }
  0xd9   :  { %1118 = vsyncpa [#allocation5], 1 }
  0xda   :  { %1119 = vsyncpa [#allocation6], 1 }

</bundles_post_ra>
